<compile_context>
chip_gen: v6e
topology: v6e:2x2x1
jax: 0.10.0
libtpu: 0.0.40
codegen_flags: <defaults>
</compile_context>

<pallas_src>
import functools
import math

import jax
import jax.numpy as jnp
from jax.experimental import pallas as pl
from jax.experimental.pallas import tpu as pltpu


# ----------------------------------------------------------------------------
# qparam helpers (plain JAX glue; scalar math over parameters)
# ----------------------------------------------------------------------------
def calc_qparams(_min, _max, bit, symmetric=False):
    eps = jnp.float32(1e-8)
    if symmetric:
        q_max = 2.0 ** (bit - 1) - 1.0
        s = jnp.maximum(jnp.maximum(jnp.abs(_min), jnp.abs(_max)) / q_max, eps)
        z = jnp.float32(0.0)
    else:
        q_max = 2.0 ** bit - 1.0
        s = jnp.maximum((_max - _min) / q_max, eps)
        z = jnp.clip(-jnp.round(_min / s), 0.0, q_max)   # clamp zero-point like PyTorch
    return jnp.asarray(s, jnp.float32), jnp.asarray(z, jnp.float32)


def quant_clip_range(bit, symmetric):
    if symmetric:
        q = 2.0 ** (bit - 1) - 1.0
        return -q, q
    return 0.0, 2.0 ** bit - 1.0


# ----------------------------------------------------------------------------
# Generation-aware VMEM budget + tile selection
# ----------------------------------------------------------------------------
def _vmem_capacity_bytes():
    """Physical VMEM of this generation; conservative 64 MiB (v7x) fallback."""
    try:
        cap = int(pltpu.get_tpu_info().vmem_capacity_bytes)
        if cap <= 0:
            raise ValueError("bad vmem capacity")
        return max(32 << 20, min(cap, 256 << 20))
    except Exception:
        return 64 << 20


_TM_CANDS = (512, 256, 128, 64, 32, 16, 8)
_TN_CANDS = (512, 256, 128)          # 256-aligned preferred for v6e/v7x MXU
_TK_CANDS = (1024, 512, 256, 128)


def _divisors(dim, cands):
    c = [c for c in cands if c <= dim and dim % c == 0]
    return c if c else [dim]


def _pick_tile(dim, candidates):
    for c in candidates:
        if c <= dim and dim % c == 0:
            return c
    return dim


def _est_matmul_vmem(tm, tn, tk, in_bytes, n_stats):
    return (2 * (tm * tk + tk * tn) * in_bytes   # double-buffered x / w tiles
            + 2 * tn * 4                          # bias
            + tm * tn * 4                         # f32 accumulator
            + 2 * tm * tn * 4                     # double-buffered output
            + 2 * n_stats * 8 * tn * 4)           # stat partial blocks


def _auto_tiles(B, OUT, IN, in_bytes, n_stats, budget):
    tm_c = _divisors(B, _TM_CANDS)
    tn_c = _divisors(OUT, _TN_CANDS)
    tk_c = _divisors(IN, _TK_CANDS)
    for tm in tm_c:                  # candidates are decreasing: first fit = biggest
        for tn in tn_c:
            for tk in tk_c:
                if _est_matmul_vmem(tm, tn, tk, in_bytes, n_stats) <= budget:
                    return tm, tn, tk
    return tm_c[-1], tn_c[-1], tk_c[-1]


# ----------------------------------------------------------------------------
# Kernel 1: fused (weight FQ) matmul + bias + ReLU (+ activation FQ) + stats
# ----------------------------------------------------------------------------
def _linear_kernel(qp_ref, x_ref, w_ref, b_ref, *refs, use_relu, want_min, want_max,
                   fq_weight, w_qmin, w_qmax, fq_act, a_qmin, a_qmax, blocked_stats):
    o_ref = refs[0]
    idx = 1
    mn_ref = mx_ref = None
    if want_min:
        mn_ref = refs[idx]; idx += 1
    if want_max:
        mx_ref = refs[idx]; idx += 1
    acc_ref = refs[idx]

    k = pl.program_id(2)

    @pl.when(k == 0)
    def _():
        acc_ref[...] = jnp.zeros_like(acc_ref)

    lhs = x_ref[...]
    rhs = w_ref[...]
    if fq_weight:
        # Fused per-tile weight fake-quant: FQ math in f32 on the loaded tile,
        # cast back to the MXU dtype.  qp holds [s_w, 1/s_w, z_w, s_a, 1/s_a, z_a].
        s_w = qp_ref[0]
        inv_s_w = qp_ref[1]
        z_w = qp_ref[2]
        wf = rhs.astype(jnp.float32)
        wq = (jnp.clip(jnp.round(wf * inv_s_w + z_w), w_qmin, w_qmax) - z_w) * s_w
        rhs = wq.astype(w_ref.dtype)
    acc_ref[...] += jnp.dot(lhs, rhs, preferred_element_type=jnp.float32)

    @pl.when(k == pl.num_programs(2) - 1)
    def _():
        out = acc_ref[...] + b_ref[...]
        if use_relu:
            out = jnp.maximum(out, 0.0)

        tn = out.shape[1]
        if want_min or want_max:
            # Stats come from the PRE-fake-quant activation (matches PyTorch get_range).
            if blocked_stats:
                # Pure-VPU blocked partial reduce to an (8, tn) tile: no XLU reduce
                # on the epilogue critical path.
                mn = mx = out[0:8, :]
                for g in range(1, out.shape[0] // 8):
                    blk = out[g * 8:(g + 1) * 8, :]
                    if want_min:
                        mn = jnp.minimum(mn, blk)
                    if want_max:
                        mx = jnp.maximum(mx, blk)
                if want_min:
                    mn_ref[...] = mn
                if want_max:
                    mx_ref[...] = mx
            else:
                if want_min:
                    mn_ref[...] = jnp.broadcast_to(jnp.min(out, keepdims=True), (8, tn))
                if want_max:
                    mx_ref[...] = jnp.broadcast_to(jnp.max(out, keepdims=True), (8, tn))

        if fq_act:
            s_a = qp_ref[3]
            inv_s_a = qp_ref[4]
            z_a = qp_ref[5]
            out = (jnp.clip(jnp.round(out * inv_s_a + z_a), a_qmin, a_qmax) - z_a) * s_a

        o_ref[...] = out.astype(o_ref.dtype)


def pcq_linear_matmul(x, w, bias, qparams, *, use_relu, want_min, want_max,
                      fq_weight, w_bit, w_symmetric, fq_act, a_bit,
                      tm=None, tn=None, tk=None):
    """x: (B, IN) mxu dtype, w: (IN, OUT) mxu dtype (kernel layout), bias: (OUT,) f32.

    qparams: f32[6] = [s_w, 1/s_w, z_w, s_a, 1/s_a, z_a] (scalar-prefetched to SMEM).
    """
    B, IN = x.shape
    IN2, OUT = w.shape
    assert IN == IN2, "x / weight inner dims mismatch"

    in_bytes = max(x.dtype.itemsize, w.dtype.itemsize)
    n_stats = int(want_min) + int(want_max)
    cap = _vmem_capacity_bytes()

    if tm is None or tn is None or tk is None:
        atm, atn, atk = _auto_tiles(B, OUT, IN, in_bytes, n_stats, int(0.45 * cap))
        tm = tm or atm
        tn = tn or atn
        tk = tk or atk
    assert B % tm == 0 and OUT % tn == 0 and IN % tk == 0, \
        f"tiles ({tm},{tn},{tk}) must evenly divide problem ({B},{OUT},{IN})"
    gm, gn, gk = B // tm, OUT // tn, IN // tk
    blocked_stats = (tm % 8 == 0)

    w_qmin, w_qmax = quant_clip_range(w_bit, w_symmetric)
    a_qmin, a_qmax = quant_clip_range(a_bit, False)

    b2d = bias.reshape(1, OUT).astype(jnp.float32)

    out_shapes = [jax.ShapeDtypeStruct((B, OUT), jnp.float32)]
    out_specs = [pl.BlockSpec((tm, tn), lambda i, j, k, qp: (i, j))]
    if want_min:
        out_shapes.append(jax.ShapeDtypeStruct((gm * 8, OUT), jnp.float32))
        out_specs.append(pl.BlockSpec((8, tn), lambda i, j, k, qp: (i, j)))
    if want_max:
        out_shapes.append(jax.ShapeDtypeStruct((gm * 8, OUT), jnp.float32))
        out_specs.append(pl.BlockSpec((8, tn), lambda i, j, k, qp: (i, j)))

    kernel = functools.partial(
        _linear_kernel, use_relu=use_relu, want_min=want_min, want_max=want_max,
        fq_weight=fq_weight, w_qmin=w_qmin, w_qmax=w_qmax,
        fq_act=fq_act, a_qmin=a_qmin, a_qmax=a_qmax, blocked_stats=blocked_stats)

    est = _est_matmul_vmem(tm, tn, tk, in_bytes, n_stats)
    vmem_limit = int(min(int(0.85 * cap), max(4 * est, 32 << 20)))

    cost = pl.CostEstimate(
        flops=2 * B * IN * OUT, transcendentals=0,
        bytes_accessed=in_bytes * (B * IN + IN * OUT) + 4 * (B * OUT + OUT))

    results = pl.pallas_call(
        kernel,
        out_shape=tuple(out_shapes),
        grid_spec=pltpu.PrefetchScalarGridSpec(
            num_scalar_prefetch=1,                                    # qparams -> SMEM
            grid=(gm, gn, gk),
            in_specs=[pl.BlockSpec((tm, tk), lambda i, j, k, qp: (i, k)),   # x
                      pl.BlockSpec((tk, tn), lambda i, j, k, qp: (k, j)),   # w (IN,OUT)
                      pl.BlockSpec((1, tn), lambda i, j, k, qp: (0, j))],   # bias
            out_specs=tuple(out_specs),
            scratch_shapes=[pltpu.VMEM((tm, tn), jnp.float32)]),
        compiler_params=pltpu.CompilerParams(
            dimension_semantics=("parallel", "parallel", "arbitrary"),
            vmem_limit_bytes=vmem_limit),
        cost_estimate=cost,
    )(qparams, x, w, b2d)

    if not isinstance(results, (tuple, list)):
        results = (results,)
    out = results[0]
    idx = 1
    out_min = out_max = None
    if want_min:
        out_min = jnp.min(results[idx]); idx += 1
    if want_max:
        out_max = jnp.max(results[idx]); idx += 1
    return out, out_min, out_max


# ----------------------------------------------------------------------------
# Kernel 2: tiled elementwise fake-quantization (EMA-range activation path)
# ----------------------------------------------------------------------------
def _fq_kernel(qp_ref, x_ref, o_ref, *, q_min, q_max):
    s = qp_ref[0]
    inv_s = qp_ref[1]     # precomputed reciprocal: mul instead of per-element divide
    z = qp_ref[2]
    x = x_ref[...]
    o_ref[...] = (jnp.clip(jnp.round(x * inv_s + z), q_min, q_max) - z) * s


def fake_quantize_array(x, s, z, *, bit, symmetric):
    R, C = x.shape
    q_min, q_max = quant_clip_range(bit, symmetric)
    br = _pick_tile(R, (1024, 512, 256, 128, 64, 32, 16, 8))
    bc = _pick_tile(C, (2048, 1024, 512, 256, 128))
    gr, gc = R // br, C // bc

    qp = jnp.stack([s, 1.0 / s, z]).astype(jnp.float32)

    kernel = functools.partial(_fq_kernel, q_min=q_min, q_max=q_max)
    cap = _vmem_capacity_bytes()
    est = 4 * (2 * br * bc + 2 * br * bc)
    vmem_limit = int(min(int(0.85 * cap), max(4 * est, 16 << 20)))
    cost = pl.CostEstimate(flops=5 * R * C, transcendentals=0, bytes_accessed=8 * R * C)

    return pl.pallas_call(
        kernel,
        out_shape=jax.ShapeDtypeStruct((R, C), jnp.float32),
        grid_spec=pltpu.PrefetchScalarGridSpec(
            num_scalar_prefetch=1,                      # qparams -> SMEM
            grid=(gr, gc),
            in_specs=[pl.BlockSpec((br, bc), lambda i, j, qp: (i, j))],
            out_specs=pl.BlockSpec((br, bc), lambda i, j, qp: (i, j))),
        compiler_params=pltpu.CompilerParams(
            dimension_semantics=("parallel", "parallel"),
            vmem_limit_bytes=vmem_limit),
        cost_estimate=cost,
    )(qp, x)


# ----------------------------------------------------------------------------
# PCQLinear module equivalent
# ----------------------------------------------------------------------------
class PCQLinearPallas:
    def __init__(self, in_features, out_features, bias=True, activation="relu",
                 w_bit=8, a_bit=8, num_clusters=4, smooth=0.995,
                 symmetric=False, key=None, tiles=(None, None, None),
                 mxu_dtype=jnp.bfloat16):
        if key is None:
            key = jax.random.PRNGKey(0)
        k1, k2 = jax.random.split(key)
        bound = 1.0 / math.sqrt(in_features)            # nn.Linear default init range
        # Weight stored permanently in (IN, OUT) kernel layout (transposed once at init,
        # equivalent to PyTorch's (OUT, IN) parameter) -> no per-call transpose.
        self.weight_t = jax.random.uniform(
            k1, (in_features, out_features), jnp.float32, -bound, bound)
        self.bias = (jax.random.uniform(k2, (out_features,), jnp.float32, -bound, bound)
                     if bias else jnp.zeros((out_features,), jnp.float32))
        self.w_bit = w_bit
        self.a_bit = a_bit
        self.symmetric = symmetric
        self.smooth = smooth
        self.num_clusters = num_clusters
        self.use_relu = activation == "relu"
        self.tiles = tiles
        # bf16 MXU inputs by default (2-3x MXU throughput, half the x/w DMA bytes);
        # set mxu_dtype=jnp.float32 for bit-strict f32 QAT numerics.
        self.mxu_dtype = mxu_dtype
        # per-cluster activation range state
        self.act_range = jnp.zeros((num_clusters, 2), jnp.float32)
        self.apply_ema = jnp.zeros((num_clusters,), jnp.bool_)
        self.refresh_weight_cache()

    def refresh_weight_cache(self):
        """Re-derive the cached MXU-dtype weight and its min/max.

        TODO(synk): call after every optimizer step that changes weight_t.
        """
        self._w_min = jnp.min(self.weight_t)
        self._w_max = jnp.max(self.weight_t)
        self._weight_mxu = self.weight_t.astype(self.mxu_dtype)

    def _qparams_vec(self, s_w=1.0, z_w=0.0, s_a=1.0, z_a=0.0):
        s_w = jnp.asarray(s_w, jnp.float32)
        s_a = jnp.asarray(s_a, jnp.float32)
        return jnp.stack([s_w, 1.0 / s_w, jnp.asarray(z_w, jnp.float32),
                          s_a, 1.0 / s_a, jnp.asarray(z_a, jnp.float32)]
                         ).astype(jnp.float32)

    def __call__(self, x, cluster=0, training=True, apply_fake_quantization=True,
                 external_range=None):
        tm, tn, tk = self.tiles
        x_mxu = x.astype(self.mxu_dtype)   # cast once at the HBM boundary

        if not training:
            # _forward_impl: plain linear (+ activation), no fake quant, no stats.
            out, _, _ = pcq_linear_matmul(
                x_mxu, self._weight_mxu, self.bias, self._qparams_vec(),
                use_relu=self.use_relu, want_min=False, want_max=False,
                fq_weight=False, w_bit=self.w_bit, w_symmetric=self.symmetric,
                fq_act=False, a_bit=self.a_bit, tm=tm, tn=tn, tk=tk)
            return out

        # ---- _pcq: weight FQ fused into the matmul (cached weight min/max) ----
        s_w, z_w = calc_qparams(self._w_min, self._w_max, self.w_bit,
                                symmetric=self.symmetric)

        # Activation FQ can be fused into the epilogue only when its qparams are
        # known before the matmul (external_range path).
        fuse_act_fq = apply_fake_quantization and (external_range is not None)
        if fuse_act_fq:
            rmin = external_range[cluster, 0]
            rmax = external_range[cluster, 1]
            s_a, z_a = calc_qparams(rmin, rmax, self.a_bit, symmetric=False)
            qp = self._qparams_vec(s_w, z_w, s_a, z_a)
        else:
            qp = self._qparams_vec(s_w, z_w)

        need_stats = external_range is None
        want_max = need_stats
        want_min = need_stats and not self.use_relu    # min unused in ReLU EMA path

        out, out_min, out_max = pcq_linear_matmul(
            x_mxu, self._weight_mxu, self.bias, qp,
            use_relu=self.use_relu, want_min=want_min, want_max=want_max,
            fq_weight=True, w_bit=self.w_bit, w_symmetric=self.symmetric,
            fq_act=fuse_act_fq, a_bit=self.a_bit, tm=tm, tn=tn, tk=tk)

        # ---- _update_activation_ranges (stateful EMA bookkeeping, JAX glue) ----
        if external_range is None:
            c = cluster
            ema = self.apply_ema[c]
            if self.use_relu:
                new_max = jnp.where(
                    ema,
                    self.act_range[c, 1] * self.smooth + out_max * (1.0 - self.smooth),
                    out_max)
                self.act_range = self.act_range.at[c, 1].set(new_max)
            else:
                new_min = jnp.where(
                    ema,
                    self.act_range[c, 0] * self.smooth + out_min * (1.0 - self.smooth),
                    out_min)
                new_max = jnp.where(
                    ema,
                    self.act_range[c, 1] * self.smooth + out_max * (1.0 - self.smooth),
                    out_max)
                self.act_range = self.act_range.at[c, 0].set(new_min)
                self.act_range = self.act_range.at[c, 1].set(new_max)
            self.apply_ema = self.apply_ema.at[c].set(True)

            # ---- _fake_quantize_activation (range depends on current batch -> separate) ----
            if apply_fake_quantization:
                s_a, z_a = calc_qparams(self.act_range[cluster, 0],
                                        self.act_range[cluster, 1],
                                        self.a_bit, symmetric=False)
                out = fake_quantize_array(out, s_a, z_a, bit=self.a_bit, symmetric=False)
        return out


# ----------------------------------------------------------------------------
# Pure-JAX reference mirroring the kernel math (bf16 at the HBM boundary)
# ----------------------------------------------------------------------------
def _fq_ref(x, s, z, q_min, q_max):
    return (jnp.clip(jnp.round(x * (1.0 / s) + z), q_min, q_max) - z) * s


def reference_forward(model, x, external_range=None, cluster=0):
    dt = model.mxu_dtype
    s_w, z_w = calc_qparams(jnp.min(model.weight_t), jnp.max(model.weight_t),
                            model.w_bit, symmetric=model.symmetric)
    wq_min, wq_max = quant_clip_range(model.w_bit, model.symmetric)
    w_m = model.weight_t.astype(dt).astype(jnp.float32)
    w_fq = _fq_ref(w_m, s_w, z_w, wq_min, wq_max).astype(dt)
    out = jnp.dot(x.astype(dt), w_fq,
                  preferred_element_type=jnp.float32) + model.bias[None, :]
    if model.use_relu:
        out = jnp.maximum(out, 0.0)
    if external_range is not None:
        rmin, rmax = external_range[cluster, 0], external_range[cluster, 1]
    else:
        # fresh cluster + ReLU: act_range = (0, out.max())
        rmin, rmax = jnp.float32(0.0), jnp.max(out)
    s_a, z_a = calc_qparams(rmin, rmax, model.a_bit, symmetric=False)
    aq_min, aq_max = quant_clip_range(model.a_bit, False)
    return _fq_ref(out, s_a, z_a, aq_min, aq_max), s_a


if __name__ == "__main__":
    key = jax.random.PRNGKey(0)
    k_x, k_m = jax.random.split(key)

    B, IN, OUT = 16, 256, 256
    NUM_CLUSTERS = 4

    x = jax.random.normal(k_x, (B, IN), jnp.float32)
    # Small explicit tiles so the demo exercises a real (2, 2, 2) grid with
    # K-accumulation, pl.when init/writeback, fused weight FQ and fused stats.
    model = PCQLinearPallas(IN, OUT, bias=True, activation="relu",
                            w_bit=8, a_bit=8, num_clusters=NUM_CLUSTERS,
                            smooth=0.995, symmetric=False, key=k_m,
                            tiles=(8, 128, 128))
    dt = model.mxu_dtype

    # ---- eval path (_forward_impl) sanity check ----
    out_eval = jax.block_until_ready(model(x, training=False))
    ref_eval = jnp.maximum(
        jnp.dot(x.astype(dt), model.weight_t.astype(dt),
                preferred_element_type=jnp.float32) + model.bias[None, :], 0.0)
    assert out_eval.shape == (B, OUT)
    err_eval = float(jnp.max(jnp.abs(out_eval - ref_eval)))
    assert err_eval < 5e-3, f"eval path mismatch: {err_eval}"

    # ---- training path: EMA range update + separate activation FQ kernel ----
    ref, s_a_ref = reference_forward(model, x)
    out = jax.block_until_ready(model(x, cluster=1, training=True,
                                      apply_fake_quantization=True))
    assert out.shape == (B, OUT) and out.dtype == jnp.float32
    tol = float(s_a_ref) * 1.5 + 1e-4          # ~1.5 activation quant steps
    max_err = float(jnp.max(jnp.abs(out - ref)))
    assert max_err <= tol, f"training path mismatch: max_err={max_err} tol={tol}"

    # ---- training path: external_range -> activation FQ fused into matmul epilogue ----
    ext = jnp.zeros((NUM_CLUSTERS, 2), jnp.float32).at[2, 1].set(3.0)
    ref_ext, s_a_ext = reference_forward(model, x, external_range=ext, cluster=2)
    out_ext = jax.block_until_ready(
        model(x, cluster=2, training=True, apply_fake_quantization=True,
              external_range=ext))
    tol_ext = float(s_a_ext) * 1.5 + 1e-4
    max_err_ext = float(jnp.max(jnp.abs(out_ext - ref_ext)))
    assert max_err_ext <= tol_ext, \
        f"external_range path mismatch: max_err={max_err_ext} tol={tol_ext}"

    print("KERNEL_OK")
</pallas_src>

<mosaic_0001>
module attributes {stable_mosaic.version = 11 : i64} {
  func.func @_linear_kernel(%arg0: i32, %arg1: i32, %arg2: i32, %arg3: memref<6xf32, #tpu.memory_space<smem>>, %arg4: memref<8x128xbf16, #tpu.memory_space<vmem>>, %arg5: memref<128x128xbf16, #tpu.memory_space<vmem>>, %arg6: memref<1x128xf32, #tpu.memory_space<vmem>>, %arg7: memref<8x128xf32, #tpu.memory_space<vmem>>, %arg8: memref<8x128xf32, #tpu.memory_space<vmem>>) attributes {dimension_semantics = [#tpu.dimension_semantics<parallel>, #tpu.dimension_semantics<parallel>, #tpu.dimension_semantics<arbitrary>], iteration_bounds = array<i64: 2, 2, 2>, scalar_prefetch = 1 : i64, scratch_operands = 1 : i64, tpu.core_type = #tpu.core_type<tc>, window_params = [{transform_indices = @transform_0, window_bounds = array<i64: 8, 128>}, {transform_indices = @transform_1, window_bounds = array<i64: 128, 128>}, {transform_indices = @transform_2, window_bounds = array<i64: 1, 128>}, {transform_indices = @transform_3, window_bounds = array<i64: 8, 128>}]} {
    %c0_i32 = arith.constant 0 : i32
    %0 = arith.cmpi eq, %arg2, %c0_i32 : i32
    %1 = arith.extui %0 : i1 to i32
    %c0_i32_0 = arith.constant 0 : i32
    %2 = arith.cmpi ne, %1, %c0_i32_0 : i32
    scf.if %2 {
      %cst_9 = arith.constant 0.000000e+00 : f32
      %12 = vector.broadcast %cst_9 : f32 to vector<8x128xf32>
      %c0_10 = arith.constant 0 : index
      %c0_11 = arith.constant 0 : index
      %13 = vector.load %arg8[%c0_10, %c0_11] : memref<8x128xf32, #tpu.memory_space<vmem>>, vector<8x128xf32>
      tpu.vector_store %arg8[%c0_10, %c0_11], %12 {strides = array<i32>} : memref<8x128xf32, #tpu.memory_space<vmem>>, vector<8x128xf32>,
    } else {
    }
    %c0 = arith.constant 0 : index
    %c0_1 = arith.constant 0 : index
    %3 = vector.load %arg4[%c0, %c0_1] : memref<8x128xbf16, #tpu.memory_space<vmem>>, vector<8x128xbf16>
    %c0_2 = arith.constant 0 : index
    %c0_3 = arith.constant 0 : index
    %4 = vector.load %arg5[%c0_2, %c0_3] : memref<128x128xbf16, #tpu.memory_space<vmem>>, vector<128x128xbf16>
    %c0_4 = arith.constant 0 : index
    %c0_5 = arith.constant 0 : index
    %5 = vector.load %arg8[%c0_4, %c0_5] : memref<8x128xf32, #tpu.memory_space<vmem>>, vector<8x128xf32>
    %cst = arith.constant dense<0.000000e+00> : vector<8x128xf32>
    %6 = tpu.matmul %3, %4, %cst {dimension_numbers = #tpu.dot_dimension_numbers<[1], [0], [0], [1], [0, 0, 1, 1], [], []>} : vector<8x128xbf16>, vector<128x128xbf16>, vector<8x128xf32> -> vector<8x128xf32>
    %7 = arith.addf %5, %6 : vector<8x128xf32>
    %c0_6 = arith.constant 0 : index
    %c0_7 = arith.constant 0 : index
    %8 = vector.load %arg8[%c0_6, %c0_7] : memref<8x128xf32, #tpu.memory_space<vmem>>, vector<8x128xf32>
    tpu.vector_store %arg8[%c0_6, %c0_7], %7 {strides = array<i32>} : memref<8x128xf32, #tpu.memory_space<vmem>>, vector<8x128xf32>,
    %c1_i32 = arith.constant 1 : i32
    %9 = arith.cmpi eq, %arg2, %c1_i32 : i32
    %10 = arith.extui %9 : i1 to i32
    %c0_i32_8 = arith.constant 0 : i32
    %11 = arith.cmpi ne, %10, %c0_i32_8 : i32
    scf.if %11 {
      %c0_9 = arith.constant 0 : index
      %c0_10 = arith.constant 0 : index
      %12 = vector.load %arg8[%c0_9, %c0_10] : memref<8x128xf32, #tpu.memory_space<vmem>>, vector<8x128xf32>
      %c0_11 = arith.constant 0 : index
      %c0_12 = arith.constant 0 : index
      %13 = vector.load %arg6[%c0_11, %c0_12] : memref<1x128xf32, #tpu.memory_space<vmem>>, vector<1x128xf32>
      %14 = vector.broadcast %13 : vector<1x128xf32> to vector<8x128xf32>
      %15 = arith.addf %12, %14 : vector<8x128xf32>
      %cst_13 = arith.constant 0.000000e+00 : f32
      %16 = vector.broadcast %cst_13 : f32 to vector<8x128xf32>
      %17 = arith.maximumf %15, %16 : vector<8x128xf32>
      %c0_14 = arith.constant 0 : index
      %c0_15 = arith.constant 0 : index
      %18 = vector.load %arg7[%c0_14, %c0_15] : memref<8x128xf32, #tpu.memory_space<vmem>>, vector<8x128xf32>
      tpu.vector_store %arg7[%c0_14, %c0_15], %17 {strides = array<i32>} : memref<8x128xf32, #tpu.memory_space<vmem>>, vector<8x128xf32>,
    } else {
    }
    return
  }
  func.func @transform_0(%arg0: i32, %arg1: i32, %arg2: i32, %arg3: memref<6xf32, #tpu.memory_space<smem>>) -> (i32, i32) {
    %c0_i32 = arith.constant 0 : i32
    return %arg0, %arg2 : i32, i32
  }
  func.func @transform_1(%arg0: i32, %arg1: i32, %arg2: i32, %arg3: memref<6xf32, #tpu.memory_space<smem>>) -> (i32, i32) {
    %c0_i32 = arith.constant 0 : i32
    return %arg2, %arg1 : i32, i32
  }
  func.func @transform_2(%arg0: i32, %arg1: i32, %arg2: i32, %arg3: memref<6xf32, #tpu.memory_space<smem>>) -> (i32, i32) {
    %c0_i32 = arith.constant 0 : i32
    %c0_i32_0 = arith.constant 0 : i32
    return %c0_i32, %arg1 : i32, i32
  }
  func.func @transform_3(%arg0: i32, %arg1: i32, %arg2: i32, %arg3: memref<6xf32, #tpu.memory_space<smem>>) -> (i32, i32) {
    %c0_i32 = arith.constant 0 : i32
    return %arg0, %arg1 : i32, i32
  }
}

</mosaic_0001>

<bundles_post_ra>
// kernel: tpu_custom_call.1
= control target key start
LH: loop header
LB: loop body
LE: loop exit
PB: predicated region body
PF: predicated region fallthrough
CT: control target
= control target key end

     0   :  { %s1000_s15 = smov [#allocation4]   ;;  %s1377_s0 = inlined_call_operand.hbm [shape: f32[6], index: 0, kind: input, shape index: {}]   ;;  %s1378_s1 = inlined_call_operand.hbm [shape: bf16[16,256], index: 1, kind: input, shape index: {}]   ;;  %s1379_s2 = inlined_call_operand.hbm [shape: bf16[256,256], index: 2, kind: input, shape index: {}]   ;;  %s1380_s3 = inlined_call_operand.vmem [shape: f32[1,256], index: 3, kind: input, shape index: {}]   ;;  %s1381_s4 = inlined_call_operand.hbm [shape: f32[16,256], index: 4, kind: output, shape index: {}]  }
   0x1   :  { %1395 = sst [smem:[#allocation26_spill]] %s1378_s1 }
   0x2   :  { %1396 = sst [smem:[#allocation27_spill]] %s1381_s4 }
   0x3   :  { %10 = dma.hbm_to_smem %s1377_s0, 16, %s1000_s15, [#allocation3] }
   0x4   :  { %922 = dma.done.wait [#allocation3], 16 }
   0x5   :  { %923 = vsyncadd [#allocation3], 4294967280 }
   0x6   :  { %12 = sfence }
   0x7   :  { %13 = vsyncpa [#allocation6], 0 }
   0x8   :  { %15 = vsyncpa [#allocation6 + $0x1], 0 }
   0x9   :  { %16 = vsyncpa [#allocation9], 0 }
   0xa   :  { %18 = vsyncpa [#allocation9 + $0x1], 0 }
   0xb   :  { %19 = vsyncpa [#allocation7], 0 }
   0xc   :  { %21 = vsyncpa [#allocation7 + $0x1], 0  ;;  %s1038_s18 = smov 0   ;;  %s1040_s19 = smov 0  }
   0xd   :  { %s1042_s20 = smov 0   ;;  %s1044_s21 = smov 0  }
   0xe   :  { %s1046_s22 = smov 0   ;;  %s1048_s0 = smov 0  }
   0xf   :  { %s1050_s23 = smov 0   ;;  %s1052_s24 = smov 0  }
  0x10   :  { %s1054_s25 = smov 0   ;;  %s1056_s26 = smov 0  }
  0x11   :  { %s1058_s27 = smov 0   ;;  %s1060_s28 = smov 0  }
  0x12   :  { %s1062_s29 = smov 0   ;;  %s1064_s30 = smov 0  }
  0x13   :  { %s1066_s5 = smov 0   ;;  %s1068_s6 = smov 0  }
  0x14 LB: > { %1397 = sst [smem:[#allocation15_spill]] %s938_s18  ;;  %s1382_s7 = sadd.s32 4294967295, %s998_s6   ;;  %s998_s6 = sphi %s1068_s6, %s27_s6   ;;  %s994_s5 = sphi %s1066_s5, %s1436_s5   ;;  %s990_s30 = sphi %s1064_s30, %s1447_s30   ;;  %s986_s29 = sphi %s1062_s29, %s1446_s29   ;;  %s982_s28 = sphi %s1060_s28, %s1433_s28   ;;  %s978_s27 = sphi %s1058_s27, %s1445_s27   ;;  %s974_s26 = sphi %s1056_s26, %s1444_s26   ;;  %s970_s25 = sphi %s1054_s25, %s1432_s25   ;;  %s966_s24 = sphi %s1052_s24, %s1443_s24   ;;  %s962_s23 = sphi %s1050_s23, %s1442_s23   ;;  %s958_s0 = sphi %s1048_s0, %s1441_s0   ;;  %s954_s22 = sphi %s1046_s22, %s1440_s22   ;;  %s950_s21 = sphi %s1044_s21, %s1439_s21   ;;  %s946_s20 = sphi %s1042_s20, %s1429_s20   ;;  %s942_s19 = sphi %s1040_s19, %s1438_s19   ;;  %s938_s18 = sphi %s1038_s18, %s1437_s18  }
  0x15   : > { %1398 = sst [smem:[#allocation16_spill]] %s946_s20  ;;  %s39_s9 = sadd.s32 1, %s986_s29 }
  0x16   : > { %1399 = sst [smem:[#allocation17_spill]] %s970_s25  ;;  %s42_s10 = sadd.s32 1, %s990_s30 }
  0x17   : > { %1400 = sst [smem:[#allocation18_spill]] %s994_s5  ;;  %p40_p0 = scmp.ge.s32.totalorder %s39_s9, 2 }
  0x18   : > { %s46_s11 = sadd.s32 1, %s994_s5  ;;  %s55_s12 = sadd.s32 1, %s970_s25 }
  0x19   : > { %p62_p1 = scmp.ne.s32.totalorder %s970_s25, %s966_s24  ;;  %s1449_s9 = smov (%p40_p0, %s39_s9), 0 }
  0x1a   : > { %1401 = sst [smem:[#allocation19_spill]] %s1449_s9  ;;  %s1451_s10 = smov (!%p40_p0, %s42_s10), %s990_s30 }
  0x1b   : > { %s51_s13 = ssub.s32 %s986_s29, %s1449_s9  ;;  %p63_p2 = scmp.eq.s32.totalorder %s998_s6, 0 }
  0x1c   : > { %p44_p3 = scmp.ge.s32.totalorder %s1451_s10, 2  ;;  %p68_p4 = scmp.ne.s32.totalorder %s966_s24, %s962_s23 }
  0x1d   : > { %p1133_p5 = por %p63_p2, %p62_p1  ;;  %p1139_p6 = scmp.eq.s32.totalorder %s1382_s7, 0 }
  0x1e   : > { %s1453_s10 = smov (%p44_p3, %s1451_s10), 0  ;;  %s1455_s11 = smov (!%p44_p3, %s46_s11), %s994_s5 }
  0x1f   : > { %1404 = sst [smem:[#allocation20_spill]] %s1453_s10  ;;  %p1148_p7 = por %p1139_p6, %p68_p4 }
  0x20   : > { %s79_s17 = ssub.s32 %s990_s30, %s1453_s10  ;;  %p48_p8 = scmp.ge.s32.totalorder %s1455_s11, 2 }
  0x21   : > { %s80_s23 = sor.u32 %s79_s17, %s51_s13  ;;  %s83_s8 = sadd.s32 1, %s958_s0 }
  0x22   : > { %p81_p9 = scmp.eq.s32.totalorder %s80_s23, 0  ;;  %s1457_s11 = smov (%p48_p8, %s1455_s11), 0 }
  0x23   : > { %1406 = sst [smem:[#allocation21_spill]] %s1457_s11  ;;  %s50_s9 = ssub.s32 %s994_s5, %s1457_s11 }
  0x24   : > { %s1158_s7 = scalar_select %p81_p9, %s958_s0, %s83_s8  }
  0x25   : > { %p90_p10 = scmp.ne.s32.totalorder %s958_s0, %s954_s22  ;;  %s52_s10 = sor.u32 %s51_s13, %s50_s9 }
  0x26   : > { %1407 = sst [smem:[#allocation22_spill]] %s1158_s7  ;;  %p96_p11 = scmp.ne.s32.totalorder %s954_s22, %s950_s21 }
  0x27   : > { %p53_p12 = scmp.eq.s32.totalorder %s52_s10, 0  ;;  %p1168_p13 = por %p90_p10, %p63_p2 }
  0x28   : > { %p1174_p0 = por %p96_p11, %p1139_p6  ;;  %s134_s11 = sor.u32 %s79_s17, %s50_s9 }
  0x29   : > { %s1179_s7 = scalar_select %p53_p12, %s970_s25, %s55_s12  }
  0x2a   : > { %s1409_s8 = scalar_select %p1174_p0, 1, 0 }
  0x2b   : > { %1410 = sst [smem:[#allocation23_spill]] %s1179_s7  ;;  %p135_p1 = scmp.eq.s32.totalorder %s134_s11, 0 }
  0x2c   : > { %s137_s13 = sadd.s32 1, %s946_s20  ;;  %p147_p3 = scmp.ne.s32.totalorder %s946_s20, %s942_s19 }
  0x2d   : > { %s1411_s21 = sadd.s32 4294967295, %s998_s6   ;;  %p153_p6 = scmp.ne.s32.totalorder %s942_s19, %s938_s18 }
  0x2e   : > { %p148_p4 = scmp.eq.s32.totalorder %s1411_s21, 7  ;;  %s1415_s9 = sadd.s32 4294967294, %s998_s6  }
  0x2f   : > { %s1187_s10 = scalar_select %p135_p1, %s946_s20, %s137_s13  }
  0x30   : > { %p1189_p2 = por %p148_p4, %p147_p3  ;;  %p154_p8 = scmp.eq.s32.totalorder %s1415_s9, 7 }
  0x31   : > { %1412 = sst [smem:[#allocation24_spill]] %s1187_s10  ;;  %p623_p9 = scmp.lt.s32.totalorder %s998_s6, 8 }
  0x32   : > { %s1413_s15 = scalar_select %p1189_p2, 1, 0 }
  0x33   : > { %s174_s11 = sand.u32 1, %s970_s25   ;;  %p1199_p10 = por %p154_p8, %p153_p6 }
  0x34   : > { %1414 = sst [smem:[#allocation25_spill]] %s1413_s15  ;;  %s549_s17 = sshll.u32 %s174_s11, 2 }
  0x35   : > { %s1416_s12 = scalar_select %p1199_p10, 1, 0 }
  0x36   : > { %s550_s13 = sshll.u32 %s994_s5, 1  ;;  %s178_s10 = scalar_lea.vmem [#allocation5], %s549_s17 }
  0x37   : > { %s183_s21 = sadd.s32 %s986_s29, %s550_s13  ;;  %s187_s20 = sshll.u32 %s178_s10, 4  ;;  %s188_s20 = int_to_ptr.vmem [resolvable:$true] %s187_s20 }
  0x38   : > { %s551_s7 = sshll.u32 %s183_s21, 6  ;;  %s1417_s1 = sld [smem:[#allocation26_spill]] }
  0x39   : > { %p1212_p11 = pnand %p623_p9, %p1133_p5  ;;  %s576_s25 = sshll.u32 %s986_s29, 5 }
  0x3a   : > { %p1221_p12 = pnand %p623_p9, %p1168_p13  ;;  %p556_p1 = scmp.ge.s32.totalorder %s998_s6, 1 }
  0x3b   : > { %p221_p3 = scmp.lt.s32.totalorder %s998_s6, 9  ;;  %s175_s10 = scalar_lea.sflag [#allocation6], %s174_s11 }
  0x3c   : > { %p778_p4 = pneg %p1212_p11  ;;  %s789_s4 = scalar_lea.vmem %s188_s20, 64 }
  0x3d   : > { %p790_p6 = scmp.ne.s32.totalorder %s188_s20, %s789_s4 }
  0x3e   : > { %s185_s18 = scalar_lea.hbm %s1417_s1, %s551_s7  ;;  %s1001_s7 = smov [#allocation5]  }
  0x3f   : > { %p792_p8 = pnand %p790_p6, %p778_p4  ;;  %s794_s14 = sshll.u32 %s1001_s7, 4  ;;  %s795_s14 = int_to_ptr.vmem [resolvable:$false] %s794_s14 }
  0x40   : > { %s796_s15 = scalar_lea.vmem %s795_s14, 128  ;;  %p797_p10 = scmp.lt.s32.totalorder %s188_s20, %s795_s14 }
  0x41   : > { %p793_p5 = pneg %p792_p8  ;;  %p798_p2 = scmp.lt.s32.totalorder %s796_s15, %s789_s4 }
  0x43   : > { %p799_p0 = por %p798_p2, %p797_p10 }
  0x45   : > { %p800_p13 = pnand %p799_p0, %p793_p5 }
  0x47   : > { %803 = shalt.err (!%p800_p13)
}
  0x48   : > { %615 = dma.hbm_to_vmem [thread:$0]  (!%p1212_p11), %s185_s18, 64, %s188_s20, %s175_s10  }
  0x49   : > { %p1235_p9 = pnand %p556_p1, %p221_p3  ;;  %s194_s11 = sand.u32 1, %s958_s0  }
  0x4a   : > { %s204_s17 = sadd.s32 %s990_s30, %s576_s25  ;;  %s552_s21 = sshll.u32 %s194_s11, 6 }
  0x4b   : > { %s555_s4 = sshll.u32 %s204_s17, 6  ;;  %s198_s15 = scalar_lea.vmem [#allocation8], %s552_s21 }
  0x4c   : > { %s206_s9 = scalar_lea.hbm %s1379_s2, %s555_s4  ;;  %s207_s1 = sshll.u32 %s198_s15, 4  ;;  %s208_s1 = int_to_ptr.vmem [resolvable:$true] %s207_s1 }
  0x4d   : > { %s195_s5 = scalar_lea.sflag [#allocation9], %s194_s11  ;;  %p806_p0 = pneg %p1221_p12 }
  0x4e   : > { %s817_s18 = scalar_lea.vmem %s208_s1, 1024  ;;  %s1002_s20 = smov [#allocation8]  }
  0x4f   : > { %p818_p2 = scmp.ne.s32.totalorder %s208_s1, %s817_s18  ;;  %s822_s10 = sshll.u32 %s1002_s20, 4  ;;  %s823_s10 = int_to_ptr.vmem [resolvable:$false] %s822_s10 }
  0x50   : > { %s824_s25 = scalar_lea.vmem %s823_s10, 2048  ;;  %p825_p1 = scmp.lt.s32.totalorder %s208_s1, %s823_s10 }
  0x51   : > { %p820_p10 = pnand %p818_p2, %p806_p0  ;;  %p826_p3 = scmp.lt.s32.totalorder %s824_s25, %s817_s18 }
  0x53   : > { %p821_p11 = pneg %p820_p10  ;;  %p827_p4 = por %p826_p3, %p825_p1 }
  0x55   : > { %p828_p6 = pnand %p827_p4, %p821_p11 }
  0x57   : > { %831 = shalt.err (!%p828_p6)
}
  0x58   : > { %s1003_s17 = smov 128   ;;  %s1004_s21 = smov 64  }
  0x59   : > { %s1005_s4 = smov 4   ;;  %225 = sbr.rel (%p1235_p9) target bundleno = 376 (0x178), region = 32 }
  0x5a   : > { %618 = dma.hbm_to_vmem [thread:$0]  (!%p1221_p12), %s206_s9, 1024, %s208_s1, %s195_s5, %s1003_s17, %s1004_s21, %s1005_s4  }
  0x5b   : > { %s227_s11 = sand.u32 (!%p1235_p9), 1, %s966_s24  }
  0x5c   : > { %s1251_s7 = sshll.u32 (!%p1235_p9), %s227_s11, 2  ;;  %s228_s14 = scalar_lea.sflag (!%p1235_p9), [#allocation6], %s227_s11 }
  0x5d   : > { %s231_s15 = scalar_lea.vmem (!%p1235_p9), [#allocation5], %s1251_s7 }
  0x5e   : > { %925 = dma.done.wait (%p1148_p7), %s228_s14, 64  }
  0x5f   : > { %927 = vsyncadd (%p1148_p7), %s228_s14, 4294967232  ;;  %s236_s13 = sand.u32 1, %s954_s22   ;;  %p1421_p12 = scmp.ne.s32.totalorder %s1409_s8, 0 }
  0x60   : > { %s558_s1 = sshll.u32 %s236_s13, 6  ;;  %s237_s5 = scalar_lea.sflag [#allocation9], %s236_s13 }
  0x61   : > { %s1259_s23 = scalar_lea.vmem [#allocation8], %s558_s1 }
  0x62   : > { %929 = dma.done.wait (%p1421_p12), %s237_s5, 1024  }
  0x63   : > { %931 = vsyncadd (%p1421_p12), %s237_s5, 4294966272  ;;  %s268_s9 = sand.u32 1, %s942_s19   ;;  %p272_p8 = scmp.lt.s32.totalorder %s978_s27, 1 }
  0x64   : > { %s1269_s16 = sshll.u32 %s268_s9, 3  ;;  %p560_p7 = scmp.ne.s32.totalorder %s974_s26, 0 }
  0x65   : > { %s1272_s18 = scalar_select %p272_p8, %s978_s27, 1 }
  0x66   : > { %s270_s17 = scalar_lea.vmem [#allocation10], %s1269_s16  ;;  %279 = sbr.rel (%p560_p7) target bundleno = 109 (0x6d), region = 44 }
  0x67   : > { %s274_s25 = scalar_lea.vmem %s1380_s3, %s1272_s18 }
  0x6b   : > { %v1006_v0 = vmov 0.0  }
  0x6c   : > { %280 = vst [vmem:[#allocation2] sm:$0xff] %v1006_v0 }
  0x6d PF: > { %v760_v1 = vld [vmem:[%s1259_s23 + $0x38] sm:$0xff]   ;;  %v1007_v2 = vmov 0.0   ;;  %v761_v3 = vld [vmem:[%s1259_s23 + $0x30] sm:$0xff]   ;;  %vm1008_vm0 = vmmov 0   ;;  %v762_v4 = vld [vmem:[%s1259_s23 + $0x28] sm:$0xff]   ;;  %p569_p5 = scmp.ne.s32.totalorder %s974_s26, 1 }
  0x6e   : > { %586 = vmatprep.subr.bf16.mxu0 %v1007_v2  ;;  %602 = vmatprep.mubr.msk.bf16.mxu0 %vm1008_vm0, %v1007_v2  ;;  %v763_v5 = vld [vmem:[%s1259_s23 + $0x20] sm:$0xff]   ;;  %v764_v6 = vld [vmem:[%s1259_s23 + $0x18] sm:$0xff]   ;;  %v765_v7 = vld [vmem:[%s1259_s23 + $0x10] sm:$0xff]  }
  0x6f   : > { %587 = vmatpush3.bf16.msra.mxu0 %v760_v1  ;;  %v766_v8 = vld [vmem:[%s1259_s23 + $0x8] sm:$0xff]   ;;  %v767_v9 = vld [vmem:[%s1259_s23] sm:$0xff]   ;;  %v281_v10 = vld [vmem:[%s231_s15] sm:$0xf] }
  0x70   : > { %588 = vmatprep.subr.bf16.mxu0 %v1007_v2 }
  0x73   : > { %589 = vmatpush3.bf16.msra.mxu0 %v761_v3  ;;  %v298_v11 = vld [vmem:[#allocation2] sm:$0xff] }
  0x74   : > { %590 = vmatprep.subr.bf16.mxu0 %v1007_v2 }
  0x77   : > { %591 = vmatpush3.bf16.msra.mxu0 %v762_v4 }
  0x78   : > { %592 = vmatprep.subr.bf16.mxu0 %v1007_v2 }
  0x7b   : > { %593 = vmatpush3.bf16.msra.mxu0 %v763_v5 }
  0x7c   : > { %594 = vmatprep.subr.bf16.mxu0 %v1007_v2 }
  0x7f   : > { %595 = vmatpush3.bf16.msra.mxu0 %v764_v6 }
  0x80   : > { %596 = vmatprep.subr.bf16.mxu0 %v1007_v2 }
  0x83   : > { %597 = vmatpush3.bf16.msra.mxu0 %v765_v7 }
  0x84   : > { %598 = vmatprep.subr.bf16.mxu0 %v1007_v2 }
  0x87   : > { %599 = vmatpush3.bf16.msra.mxu0 %v766_v8 }
  0x88   : > { %600 = vmatprep.subr.bf16.mxu0 %v1007_v2 }
  0x8b   : > { %601 = vmatpush3.bf16.msra.mxu0 %v767_v9 }
  0x8e   : > { %603 = vmatmul.mubr.bf16.vlgmr.msra.gmra.mxu0 %v281_v10 }
 0x14e   : > { %v381_v12 = vpop.f32.mrf.mxu0 }
 0x14f   : > { %v387_v13 = vadd.f32 %v381_v12, %v298_v11 }
 0x150   : > { %v604_v14 = vpop.f32.mrf.mxu0  ;;  %392 = sbr.rel (%p569_p5) target bundleno = 350 (0x15e), region = 48 }
 0x151   : > { %388 = vst [vmem:[#allocation2] sm:$0xff] %v387_v13 }
 0x152   : > { %v384_v15 = vpop.f32.mrf.mxu0 }
 0x154   : > { %v605_v16 = vpop.f32.mrf.mxu0 }
 0x155   : > { %v570_v18 = vld [vmem:[%s274_s25] ss:$0 sm:$0xff] }
 0x158   : > { %v393_v17 = vld [vmem:[#allocation2] sm:$0xff] }
 0x159   : > { %v401_v19 = vadd.f32 %v570_v18, %v393_v17 }
 0x15b   : > { %v402_v20 = vmax.f32 %v401_v19, 0.0 }
 0x15d   : > { %403 = vst [vmem:[%s270_s17] sm:$0xff] %v402_v20 }
 0x15e PF: > { %s1422_s4 = sld [smem:[#allocation25_spill]]  ;;  %s572_s26 = sshll.u32 %s982_s28, 1 }
 0x15f   : > { %s416_s11 = sadd.s32 %s978_s27, %s572_s26  ;;  %s420_s7 = sshll.u32 %s270_s17, 4  ;;  %s421_s7 = int_to_ptr.vmem [resolvable:$true] %s420_s7 }
 0x160   : > { %s573_s14 = sshll.u32 %s416_s11, 7  ;;  %s1423_s1 = sld [smem:[#allocation27_spill]] }
 0x161   : > { %s405_s23 = scalar_lea.sflag [#allocation7], %s268_s9  ;;  %s832_s18 = scalar_lea.vmem %s421_s7, 128 }
 0x162   : > { %p833_p13 = scmp.ne.s32.totalorder %s421_s7, %s832_s18  ;;  %s1009_s20 = smov [#allocation10]  }
 0x163   : > { %s836_s10 = sshll.u32 %s1009_s20, 4  ;;  %s837_s10 = int_to_ptr.vmem [resolvable:$false] %s836_s10 }
 0x164   : > { %p1424_p9 = scmp.ne.s32.totalorder %s1422_s4, 0  ;;  %s838_s28 = scalar_lea.vmem %s837_s10, 256 }
 0x165   : > { %p839_p10 = scmp.lt.s32.totalorder %s421_s7, %s837_s10  ;;  %p840_p11 = scmp.lt.s32.totalorder %s838_s28, %s832_s18 }
 0x166   : > { %s418_s5 = scalar_lea.hbm %s1423_s1, %s573_s14  ;;  %p834_p0 = pnand %p833_p13, %p1424_p9 }
 0x167   : > { %p841_p1 = por %p840_p11, %p839_p10 }
 0x168   : > { %p835_p2 = pneg %p834_p0 }
 0x16a   : > { %p842_p3 = pnand %p841_p1, %p835_p2 }
 0x16c   : > { %845 = shalt.err (!%p842_p3)
}
 0x16d   : > { %s846_s27 = scalar_lea.hbm %s418_s5, 128  ;;  %s850_s25 = scalar_lea.hbm %s1423_s1, 512 }
 0x16e   : > { %p847_p4 = scmp.ne.s32.totalorder %s418_s5, %s846_s27  ;;  %p851_p8 = scmp.lt.s32.totalorder %s418_s5, %s1423_s1 }
 0x16f   : > { %p852_p7 = scmp.lt.s32.totalorder %s850_s25, %s846_s27 }
 0x170   : > { %p848_p6 = pnand %p847_p4, %p1424_p9 }
 0x171   : > { %p853_p5 = por %p852_p7, %p851_p8 }
 0x172   : > { %p849_p12 = pneg %p848_p6 }
 0x174   : > { %p854_p13 = pnand %p853_p5, %p849_p12 }
 0x176   : > { %857 = shalt.err (!%p854_p13)
}
 0x177   : > { %610 = dma.vmem_to_hbm [thread:$0]  (%p1424_p9), %s421_s7, 128, %s418_s5, %s405_s23  }
 0x178 PF: > { %s1425_s21 = sld [smem:[#allocation15_spill]]  ;;  %p624_p0 = scmp.ge.s32.totalorder %s998_s6, 2 }
 0x179   : > { %p1426_p2 = scmp.ne.s32.totalorder %s1416_s12, 0 }
 0x17b   : > { %p620_p10 = pnand %p624_p0, %p1426_p2 }
 0x17d   : > { %p621_p11 = pneg %p620_p10 }
 0x17e   : > { %s432_s26 = sand.u32 1, %s1425_s21  }
 0x17f   : > { %s433_s11 = scalar_lea.sflag [#allocation7], %s432_s26 }
 0x180   : > { %933 = dma.done.wait (%p621_p11), %s433_s11, 128  }
 0x181   : > { %935 = vsyncadd (%p621_p11), %s433_s11, 4294967168  ;;  %s27_s6 = sadd.s32 1, %s998_s6   ;;  %s1428_s4 = sld [smem:[#allocation16_spill]] }
 0x182   : > { %p1324_p1 = scmp.ge.s32.totalorder %s27_s6, 10   ;;  %s1429_s20 = sld [smem:[#allocation24_spill]] }
 0x183   : > { %s1430_s7 = sld [smem:[#allocation22_spill]]  ;;  %s1437_s18 = smov %s942_s19 }
 0x184   : > { %s1431_s15 = sld [smem:[#allocation17_spill]]  ;;  %s1439_s21 = smov %s954_s22 }
 0x185   : > { %s1432_s25 = sld [smem:[#allocation23_spill]]  ;;  %s1440_s22 = smov %s958_s0 }
 0x186   : > { %s1433_s28 = sld [smem:[#allocation18_spill]]  ;;  %s1442_s23 = smov %s966_s24 }
 0x187   : > { %s1434_s12 = sld [smem:[#allocation19_spill]]  ;;  %s1438_s19 = smov %s1428_s4 }
 0x188   : > { %s1435_s13 = sld [smem:[#allocation20_spill]]  ;;  %s1444_s26 = smov %s986_s29 }
 0x189   : > { %s1436_s5 = sld [smem:[#allocation21_spill]]  ;;  %s1441_s0 = smov %s1430_s7 }
 0x18a   : > { %s1443_s24 = smov %s1431_s15  ;;  %s1445_s27 = smov %s990_s30 }
 0x18b   :  { %26 = sbr.rel (!%p1324_p1) target bundleno = 20 (0x14), region = 101 }
 0x18d   : > { %s1446_s29 = smov %s1434_s12 }
 0x18e   : > { %s1447_s30 = smov %s1435_s13 }
 0x190   :  { %438 = vsyncpa [#allocation6], 1 }
 0x191   :  { %440 = vsyncpa [#allocation6 + $0x1], 1 }
 0x192   :  { %441 = vsyncpa [#allocation9], 1 }
 0x193   :  { %443 = vsyncpa [#allocation9 + $0x1], 1 }
 0x194   :  { %444 = vsyncpa [#allocation7], 1 }
 0x195   :  { %446 = vsyncpa [#allocation7 + $0x1], 1 }

</bundles_post_ra>
